<compile_context>
chip_gen: v6e
topology: v6e:2x2x1
jax: 0.10.0
libtpu: 0.0.40
codegen_flags: <defaults>
</compile_context>

<pallas_src>
import functools

import jax
import jax.numpy as jnp
from jax.experimental import pallas as pl
from jax.experimental.pallas import tpu as pltpu


def _round_up(x, m):
    return (x + m - 1) // m * m


def _vmem_budget_bytes():
    """Generation-aware VMEM budget (~96 MiB on v5e/v6e, ~48 MiB on v7x)."""
    cap = 128 * 1024 * 1024
    try:
        info = pltpu.get_tpu_info()
        cap = int(getattr(info, "vmem_capacity_bytes", cap) or cap)
    except Exception:
        pass
    return cap * 3 // 4


# ----------------------------------------------------------------------------
# Parameter preparation (done ONCE, outside the forward pass).
# ----------------------------------------------------------------------------
def prepare_mlp_params(params, *, param_dtype=jnp.bfloat16, lane_multiple=128):
    """Pad/cast the weights once so the forward pass emits no extra XLA ops.

    params: list of (w, b) with w: (n_in, n_out), b: (n_out,) or (1, n_out).
    Hidden dims are zero-padded to `lane_multiple` (use 256 on v6e/v7x when the
    layer dims are small/odd); the first layer keeps the true input_dim rows
    (x is passed unpadded) and the last layer keeps the true output_dim cols
    (output is written unpadded).
    """
    num_layers = len(params)
    layers, dims = [], []
    prev_out_p = None
    for li, (w, b) in enumerate(params):
        n_in, n_out = w.shape
        dims.append((n_in, n_out))
        in_p = n_in if li == 0 else prev_out_p
        last = li == num_layers - 1
        out_p = n_out if last else _round_up(n_out, lane_multiple)
        w_p = jnp.zeros((in_p, out_p), param_dtype).at[:n_in, :n_out].set(
            w.astype(param_dtype))
        b2 = jnp.asarray(b).reshape(1, -1).astype(param_dtype)
        b_p = jnp.zeros((1, out_p), param_dtype).at[:, :n_out].set(b2)
        layers.append((w_p, b_p))
        prev_out_p = out_p
    return {"layers": layers, "dims": dims}


def _resident_spec(shape, single_buffer):
    # Constant index_map -> the block never changes between grid steps.
    # Single-buffering it halves resident weight VMEM (matters most on v7x).
    if single_buffer:
        try:
            return pl.BlockSpec(shape, lambda i: (0, 0),
                                pipeline_mode=pl.Buffered(1))
        except TypeError:
            pass
    return pl.BlockSpec(shape, lambda i: (0, 0))


# ----------------------------------------------------------------------------
# Fused path: one pallas_call, grid only over row tiles, weights resident.
# ----------------------------------------------------------------------------
def _mlp_fused_kernel(*refs, num_layers, compute_dtype):
    """refs = (x_tile, w1, b1, ..., wn, bn, out_tile)."""
    x_ref, o_ref = refs[0], refs[-1]
    h = x_ref[...].astype(compute_dtype)
    for li in range(num_layers):
        w_ref = refs[1 + 2 * li]
        b_ref = refs[2 + 2 * li]
        y = jnp.dot(h, w_ref[...], preferred_element_type=jnp.float32)
        y = y + b_ref[...].astype(jnp.float32)
        if li < num_layers - 1:
            # ReLU on the VPU; keep inter-layer activations in compute_dtype so
            # large hidden dims don't keep two multi-MiB f32 tiles live.
            h = jnp.maximum(y, 0.0).astype(compute_dtype)
        else:
            h = y
    o_ref[...] = h.astype(o_ref.dtype)
    # TODO(synk): for very large hidden dims, additionally chunk each layer's
    # output N with an inner fori_loop to bound live intermediates further.


def _fused_forward(x2d, layers, out_dtype, *, budget, max_row_tile,
                   single_buffer, cost):
    M, Din = x2d.shape
    num_layers = len(layers)
    out_cols = layers[-1][0].shape[1]
    compute_dtype = layers[0][0].dtype

    # Row tile from the VMEM left after resident weights (no row padding;
    # pl.cdiv grid + Pallas edge masking handles ragged M).
    wbytes = sum(w.nbytes + b.nbytes for (w, b) in layers)
    resident = wbytes * (1 if single_buffer else 2)
    max_width = max([Din] + [w.shape[1] for (w, _) in layers])
    c_item = jnp.dtype(compute_dtype).itemsize
    per_row = (2 * Din * x2d.dtype.itemsize                      # x double-buffer
               + 2 * out_cols * jnp.dtype(out_dtype).itemsize    # out double-buffer
               + max_width * (4 + c_item))                       # live y(f32)+h
    per_row = int(per_row * 1.5) + 64                            # safety margin
    avail = max(budget - resident, 0)
    tm = min(max_row_tile, _round_up(M, 8),
             max(8, (avail // per_row) // 8 * 8))

    in_specs = [pl.BlockSpec((tm, Din), lambda i: (i, 0))]
    flat = [x2d]
    for (w, b) in layers:
        in_specs.append(_resident_spec(w.shape, single_buffer))
        in_specs.append(_resident_spec(b.shape, single_buffer))
        flat.extend([w, b])

    kernel = functools.partial(_mlp_fused_kernel, num_layers=num_layers,
                               compute_dtype=compute_dtype)
    return pl.pallas_call(
        kernel,
        out_shape=jax.ShapeDtypeStruct((M, out_cols), out_dtype),
        grid_spec=pltpu.PrefetchScalarGridSpec(
            num_scalar_prefetch=0,
            grid=(pl.cdiv(M, tm),),
            in_specs=in_specs,
            out_specs=pl.BlockSpec((tm, out_cols), lambda i: (i, 0)),
        ),
        compiler_params=pltpu.CompilerParams(
            dimension_semantics=("parallel",),
            vmem_limit_bytes=int(budget),
        ),
        cost_estimate=cost,
    )(*flat)


# ----------------------------------------------------------------------------
# Fallback path: per-layer K/N-tiled matmul (+bias +ReLU) for huge layers.
# ----------------------------------------------------------------------------
def _linear_tiled_kernel(x_ref, w_ref, b_ref, o_ref, acc_ref, *,
                         apply_relu, compute_dtype):
    @pl.when(pl.program_id(2) == 0)
    def _():
        acc_ref[...] = jnp.zeros_like(acc_ref)

    acc_ref[...] += jnp.dot(x_ref[...].astype(compute_dtype), w_ref[...],
                            preferred_element_type=jnp.float32)

    @pl.when(pl.program_id(2) == pl.num_programs(2) - 1)
    def _():
        y = acc_ref[...] + b_ref[...].astype(jnp.float32)
        if apply_relu:
            y = jnp.maximum(y, 0.0)
        o_ref[...] = y.astype(o_ref.dtype)


def _pick_tile(dim, candidates=(512, 256, 128)):
    # Non-128-multiple dims use a single full-extent block so the reduction
    # never reads padded garbage; lane-padded dims get a dividing tile.
    if dim % 128 != 0:
        return dim
    for c in candidates:
        if dim % c == 0:
            return c
    return 128


def _linear_tiled(x2d, w, b, *, apply_relu, out_dtype, budget, max_row_tile):
    M, K = x2d.shape
    _, N = w.shape
    compute_dtype = w.dtype
    tk = _pick_tile(K)
    tn = _pick_tile(N)
    xi = x2d.dtype.itemsize
    wi = w.dtype.itemsize
    oi = jnp.dtype(out_dtype).itemsize

    tm = min(max_row_tile, _round_up(M, 8))

    def vmem_need(tm_):
        return (2 * tm_ * tk * xi + 2 * tk * tn * wi + 2 * tn * wi
                + 2 * tm_ * tn * oi + tm_ * tn * 4)

    while tm > 8 and vmem_need(tm) > budget:
        tm = max(8, (tm // 2) // 8 * 8)

    cost = pl.CostEstimate(
        flops=2 * M * K * N, transcendentals=0,
        bytes_accessed=x2d.nbytes + w.nbytes + b.nbytes + M * N * oi)
    kernel = functools.partial(_linear_tiled_kernel, apply_relu=apply_relu,
                               compute_dtype=compute_dtype)
    return pl.pallas_call(
        kernel,
        out_shape=jax.ShapeDtypeStruct((M, N), out_dtype),
        grid_spec=pltpu.PrefetchScalarGridSpec(
            num_scalar_prefetch=0,
            grid=(pl.cdiv(M, tm), N // tn, K // tk),
            in_specs=[
                pl.BlockSpec((tm, tk), lambda i, j, k: (i, k)),
                pl.BlockSpec((tk, tn), lambda i, j, k: (k, j)),
                pl.BlockSpec((1, tn), lambda i, j, k: (0, j)),
            ],
            out_specs=pl.BlockSpec((tm, tn), lambda i, j, k: (i, j)),
            scratch_shapes=[pltpu.VMEM((tm, tn), jnp.float32)],
        ),
        compiler_params=pltpu.CompilerParams(
            dimension_semantics=("parallel", "parallel", "arbitrary"),
            vmem_limit_bytes=int(budget),
        ),
        cost_estimate=cost,
    )(x2d, w, b)


def _tiled_forward(x2d, layers, out_dtype, *, budget, max_row_tile):
    h = x2d
    n = len(layers)
    for li, (w, b) in enumerate(layers):
        last = li == n - 1
        h = _linear_tiled(h, w, b, apply_relu=not last,
                          out_dtype=out_dtype if last else w.dtype,
                          budget=budget, max_row_tile=max_row_tile)
    return h


# ----------------------------------------------------------------------------
# Public forward.
# ----------------------------------------------------------------------------
def mlp_forward(x, prepared, *, max_row_tile=512, force_tiled=False,
                single_buffer_weights=None):
    """x: (..., input_dim) -> (..., output_dim); ReLU between layers.

    `prepared` is the result of prepare_mlp_params (preferred -- pad/cast is
    hoisted out of the forward), or a raw list of (w, b) pairs.
    """
    if not isinstance(prepared, dict):
        prepared = prepare_mlp_params(prepared)   # convenience; prefer hoisting
    layers, dims = prepared["layers"], prepared["dims"]

    lead = x.shape[:-1]
    Din = x.shape[-1]
    assert Din == dims[0][0], "input feature dim mismatch"
    x2d = x.reshape(-1, Din)
    M = x2d.shape[0]
    out_dtype = x.dtype
    Dout = dims[-1][1]

    budget = _vmem_budget_bytes()
    wbytes = sum(w.nbytes + b.nbytes for (w, b) in layers)
    if single_buffer_weights is None:
        single_buffer_weights = wbytes > (4 << 20)   # only worth it when big
    resident = wbytes * (1 if single_buffer_weights else 2)

    flops = 2 * M * sum(w.shape[0] * w.shape[1] for (w, _) in layers)
    bytes_accessed = (x2d.nbytes + M * Dout * jnp.dtype(out_dtype).itemsize
                      + wbytes)
    cost = pl.CostEstimate(flops=flops, transcendentals=0,
                           bytes_accessed=bytes_accessed)

    # Generation-aware fallback: fires at roughly half the weight bytes on v7x
    # (64 MiB/TC) compared with v5e/v6e (128 MiB), since budget scales with it.
    # TODO(synk): on v7x, split the widest layer's output dim across the two
    # TensorCores (core_map) instead of replicating full weights per core.
    if force_tiled or resident > budget * 7 // 10:
        out2d = _tiled_forward(x2d, layers, out_dtype,
                               budget=budget, max_row_tile=max_row_tile)
    else:
        out2d = _fused_forward(x2d, layers, out_dtype, budget=budget,
                               max_row_tile=max_row_tile,
                               single_buffer=single_buffer_weights, cost=cost)
    return out2d.reshape(*lead, Dout)


# ----------------------------------------------------------------------------
# Init + reference + test.
# ----------------------------------------------------------------------------
def init_mlp_params(key, input_dim, hidden_dim, output_dim, num_layers,
                    dtype=jnp.float32):
    """Deterministic params mirroring nn.Linear shapes (stored transposed)."""
    h = [hidden_dim] * (num_layers - 1)
    dims = list(zip([input_dim] + h, h + [output_dim]))
    params = []
    for (n_in, n_out) in dims:
        kw, kb, key = jax.random.split(key, 3)
        bound = 1.0 / float(jnp.sqrt(jnp.asarray(n_in, dtype)))
        w = jax.random.uniform(kw, (n_in, n_out), dtype, -bound, bound)
        b = jax.random.uniform(kb, (n_out,), dtype, -bound, bound)
        params.append((w, b))
    return params


def mlp_reference(x, params):
    """Pure-JAX reference matching MLP.forward."""
    n = len(params)
    for i, (w, b) in enumerate(params):
        x = jnp.dot(x, w) + b
        if i < n - 1:
            x = jnp.maximum(x, 0.0)
    return x


if __name__ == "__main__":
    key = jax.random.PRNGKey(0)
    kx, kp = jax.random.split(key)

    batch, seq = 2, 8
    input_dim, hidden_dim, output_dim, num_layers = 32, 64, 16, 3

    x = jax.random.normal(kx, (batch, seq, input_dim), jnp.float32)
    params = init_mlp_params(kp, input_dim, hidden_dim, output_dim, num_layers)
    ref = mlp_reference(x, params)

    # Pad/cast once (hoisted out of the forward pass).
    prepared_bf16 = prepare_mlp_params(params, param_dtype=jnp.bfloat16)
    prepared_f32 = prepare_mlp_params(params, param_dtype=jnp.float32)

    out = jax.block_until_ready(mlp_forward(x, prepared_bf16))          # fused, bf16
    out_f32 = jax.block_until_ready(mlp_forward(x, prepared_f32))       # fused, f32
    out_tiled = jax.block_until_ready(                                  # K/N-tiled path
        mlp_forward(x, prepared_bf16, force_tiled=True))

    assert out.shape == (batch, seq, output_dim)
    for got in (out, out_f32, out_tiled):
        g = got.astype(jnp.float32)
        assert jnp.allclose(g, ref, atol=2e-2, rtol=2e-2), float(
            jnp.max(jnp.abs(g - ref)))

    print("KERNEL_OK")
</pallas_src>

<mosaic_0001>
module attributes {stable_mosaic.version = 11 : i64} {
  func.func @_mlp_fused_kernel(%arg0: i32, %arg1: memref<16x32xf32, #tpu.memory_space<vmem>>, %arg2: memref<32x128xbf16, #tpu.memory_space<vmem>>, %arg3: memref<1x128xbf16, #tpu.memory_space<vmem>>, %arg4: memref<128x128xbf16, #tpu.memory_space<vmem>>, %arg5: memref<1x128xbf16, #tpu.memory_space<vmem>>, %arg6: memref<128x16xbf16, #tpu.memory_space<vmem>>, %arg7: memref<1x16xbf16, #tpu.memory_space<vmem>>, %arg8: memref<16x16xf32, #tpu.memory_space<vmem>>) attributes {dimension_semantics = [#tpu.dimension_semantics<parallel>], iteration_bounds = array<i64: 1>, scalar_prefetch = 0 : i64, scratch_operands = 0 : i64, tpu.core_type = #tpu.core_type<tc>, window_params = [{transform_indices = @transform_0, window_bounds = array<i64: 16, 32>}, {pipeline_mode = #tpu.pipeline_mode<synchronous>, transform_indices = @transform_1, window_bounds = array<i64: 32, 128>}, {pipeline_mode = #tpu.pipeline_mode<synchronous>, transform_indices = @transform_2, window_bounds = array<i64: 1, 128>}, {pipeline_mode = #tpu.pipeline_mode<synchronous>, transform_indices = @transform_3, window_bounds = array<i64: 128, 128>}, {pipeline_mode = #tpu.pipeline_mode<synchronous>, transform_indices = @transform_4, window_bounds = array<i64: 1, 128>}, {pipeline_mode = #tpu.pipeline_mode<synchronous>, transform_indices = @transform_5, window_bounds = array<i64: 128, 16>}, {pipeline_mode = #tpu.pipeline_mode<synchronous>, transform_indices = @transform_6, window_bounds = array<i64: 1, 16>}, {transform_indices = @transform_7, window_bounds = array<i64: 16, 16>}]} {
    %c0 = arith.constant 0 : index
    %c0_0 = arith.constant 0 : index
    %0 = vector.load %arg1[%c0, %c0_0] : memref<16x32xf32, #tpu.memory_space<vmem>>, vector<16x32xf32>
    %1 = arith.truncf %0 : vector<16x32xf32> to vector<16x32xbf16>
    %c0_1 = arith.constant 0 : index
    %c0_2 = arith.constant 0 : index
    %2 = vector.load %arg2[%c0_1, %c0_2] : memref<32x128xbf16, #tpu.memory_space<vmem>>, vector<32x128xbf16>
    %cst = arith.constant dense<0.000000e+00> : vector<16x128xf32>
    %3 = tpu.matmul %1, %2, %cst {dimension_numbers = #tpu.dot_dimension_numbers<[1], [0], [0], [1], [0, 0, 1, 1], [], []>} : vector<16x32xbf16>, vector<32x128xbf16>, vector<16x128xf32> -> vector<16x128xf32>
    %c0_3 = arith.constant 0 : index
    %c0_4 = arith.constant 0 : index
    %4 = vector.load %arg3[%c0_3, %c0_4] : memref<1x128xbf16, #tpu.memory_space<vmem>>, vector<1x128xbf16>
    %5 = arith.extf %4 : vector<1x128xbf16> to vector<1x128xf32>
    %6 = vector.broadcast %5 : vector<1x128xf32> to vector<16x128xf32>
    %7 = arith.addf %3, %6 : vector<16x128xf32>
    %cst_5 = arith.constant 0.000000e+00 : f32
    %8 = vector.broadcast %cst_5 : f32 to vector<16x128xf32>
    %9 = arith.maximumf %7, %8 : vector<16x128xf32>
    %10 = arith.truncf %9 : vector<16x128xf32> to vector<16x128xbf16>
    %c0_6 = arith.constant 0 : index
    %c0_7 = arith.constant 0 : index
    %11 = vector.load %arg4[%c0_6, %c0_7] : memref<128x128xbf16, #tpu.memory_space<vmem>>, vector<128x128xbf16>
    %cst_8 = arith.constant dense<0.000000e+00> : vector<16x128xf32>
    %12 = tpu.matmul %10, %11, %cst_8 {dimension_numbers = #tpu.dot_dimension_numbers<[1], [0], [0], [1], [0, 0, 1, 1], [], []>} : vector<16x128xbf16>, vector<128x128xbf16>, vector<16x128xf32> -> vector<16x128xf32>
    %c0_9 = arith.constant 0 : index
    %c0_10 = arith.constant 0 : index
    %13 = vector.load %arg5[%c0_9, %c0_10] : memref<1x128xbf16, #tpu.memory_space<vmem>>, vector<1x128xbf16>
    %14 = arith.extf %13 : vector<1x128xbf16> to vector<1x128xf32>
    %15 = vector.broadcast %14 : vector<1x128xf32> to vector<16x128xf32>
    %16 = arith.addf %12, %15 : vector<16x128xf32>
    %cst_11 = arith.constant 0.000000e+00 : f32
    %17 = vector.broadcast %cst_11 : f32 to vector<16x128xf32>
    %18 = arith.maximumf %16, %17 : vector<16x128xf32>
    %19 = arith.truncf %18 : vector<16x128xf32> to vector<16x128xbf16>
    %c0_12 = arith.constant 0 : index
    %c0_13 = arith.constant 0 : index
    %20 = vector.load %arg6[%c0_12, %c0_13] : memref<128x16xbf16, #tpu.memory_space<vmem>>, vector<128x16xbf16>
    %cst_14 = arith.constant dense<0.000000e+00> : vector<16x16xf32>
    %21 = tpu.matmul %19, %20, %cst_14 {dimension_numbers = #tpu.dot_dimension_numbers<[1], [0], [0], [1], [0, 0, 1, 1], [], []>} : vector<16x128xbf16>, vector<128x16xbf16>, vector<16x16xf32> -> vector<16x16xf32>
    %c0_15 = arith.constant 0 : index
    %c0_16 = arith.constant 0 : index
    %22 = vector.load %arg7[%c0_15, %c0_16] : memref<1x16xbf16, #tpu.memory_space<vmem>>, vector<1x16xbf16>
    %23 = arith.extf %22 : vector<1x16xbf16> to vector<1x16xf32>
    %24 = vector.broadcast %23 : vector<1x16xf32> to vector<16x16xf32>
    %25 = arith.addf %21, %24 : vector<16x16xf32>
    %c0_17 = arith.constant 0 : index
    %c0_18 = arith.constant 0 : index
    %26 = vector.load %arg8[%c0_17, %c0_18] : memref<16x16xf32, #tpu.memory_space<vmem>>, vector<16x16xf32>
    tpu.vector_store %arg8[%c0_17, %c0_18], %25 {strides = array<i32>} : memref<16x16xf32, #tpu.memory_space<vmem>>, vector<16x16xf32>,
    return
  }
  func.func @transform_0(%arg0: i32) -> (i32, i32) {
    %c0_i32 = arith.constant 0 : i32
    %c0_i32_0 = arith.constant 0 : i32
    return %arg0, %c0_i32 : i32, i32
  }
  func.func @transform_1(%arg0: i32) -> (i32, i32) {
    %c0_i32 = arith.constant 0 : i32
    %c0_i32_0 = arith.constant 0 : i32
    %c0_i32_1 = arith.constant 0 : i32
    return %c0_i32, %c0_i32_0 : i32, i32
  }
  func.func @transform_2(%arg0: i32) -> (i32, i32) {
    %c0_i32 = arith.constant 0 : i32
    %c0_i32_0 = arith.constant 0 : i32
    %c0_i32_1 = arith.constant 0 : i32
    return %c0_i32, %c0_i32_0 : i32, i32
  }
  func.func @transform_3(%arg0: i32) -> (i32, i32) {
    %c0_i32 = arith.constant 0 : i32
    %c0_i32_0 = arith.constant 0 : i32
    %c0_i32_1 = arith.constant 0 : i32
    return %c0_i32, %c0_i32_0 : i32, i32
  }
  func.func @transform_4(%arg0: i32) -> (i32, i32) {
    %c0_i32 = arith.constant 0 : i32
    %c0_i32_0 = arith.constant 0 : i32
    %c0_i32_1 = arith.constant 0 : i32
    return %c0_i32, %c0_i32_0 : i32, i32
  }
  func.func @transform_5(%arg0: i32) -> (i32, i32) {
    %c0_i32 = arith.constant 0 : i32
    %c0_i32_0 = arith.constant 0 : i32
    %c0_i32_1 = arith.constant 0 : i32
    return %c0_i32, %c0_i32_0 : i32, i32
  }
  func.func @transform_6(%arg0: i32) -> (i32, i32) {
    %c0_i32 = arith.constant 0 : i32
    %c0_i32_0 = arith.constant 0 : i32
    %c0_i32_1 = arith.constant 0 : i32
    return %c0_i32, %c0_i32_0 : i32, i32
  }
  func.func @transform_7(%arg0: i32) -> (i32, i32) {
    %c0_i32 = arith.constant 0 : i32
    %c0_i32_0 = arith.constant 0 : i32
    return %arg0, %c0_i32 : i32, i32
  }
}

</mosaic_0001>

<bundles_post_ra>
// kernel: tpu_custom_call.1
= control target key start
LH: loop header
LB: loop body
LE: loop exit
PB: predicated region body
PF: predicated region fallthrough
CT: control target
= control target key end

     0   :  { %12 = vsyncpa [#allocation3], 0  ;;  %s701_s0 = inlined_call_operand.hbm [shape: f32[16,32], index: 0, kind: input, shape index: {}]   ;;  %s702_s1 = inlined_call_operand.hbm [shape: bf16[32,128], index: 1, kind: input, shape index: {}]   ;;  %s703_s2 = inlined_call_operand.vmem [shape: bf16[1,128], index: 2, kind: input, shape index: {}]   ;;  %s704_s3 = inlined_call_operand.vmem [shape: bf16[128,128], index: 3, kind: input, shape index: {}]   ;;  %s705_s4 = inlined_call_operand.vmem [shape: bf16[1,128], index: 4, kind: input, shape index: {}]   ;;  %s706_s5 = inlined_call_operand.vmem [shape: bf16[128,16], index: 5, kind: input, shape index: {}]   ;;  %s707_s6 = inlined_call_operand.vmem [shape: bf16[1,16], index: 6, kind: input, shape index: {}]   ;;  %s708_s7 = inlined_call_operand.hbm [shape: f32[16,16], index: 7, kind: output, shape index: {}]  }
   0x1   :  { %13 = vsyncpa [#allocation6], 0 }
   0x2   :  { %14 = vsyncpa [#allocation4], 0  ;;  %s556_s24 = smov [#allocation2]  }
   0x3   :  { %s20_s25 = sshll.u32 %s556_s24, 4  ;;  %s21_s25 = int_to_ptr.vmem [resolvable:$true] %s20_s25 }
   0x4   :  { %s498_s26 = scalar_lea.vmem %s21_s25, 256  ;;  %p503_p1 = scmp.lt.s32.totalorder %s21_s25, %s21_s25 }
   0x5   :  { %p499_p0 = scmp.ne.s32.totalorder %s21_s25, %s498_s26  ;;  %p504_p2 = scmp.lt.s32.totalorder %s498_s26, %s498_s26 }
   0x7   :  { %p505_p3 = por %p504_p2, %p503_p1 }
   0x9   :  { %p506_p4 = pnand %p505_p3, %p499_p0 }
   0xb   :  { %509 = shalt.err (!%p506_p4)
}
   0xc   :  { %s557_s27 = smov 128   ;;  %s558_s28 = smov 8  }
   0xd   :  { %26 = dma.hbm_to_vmem [thread:$0]  %s701_s0, 256, %s21_s25, [#allocation3], %s557_s27, %s557_s27, %s558_s28  }
   0xe   :  { %s559_s8 = smov [#allocation5]  }
   0xf   :  { %s32_s9 = sshll.u32 %s559_s8, 4  ;;  %s33_s9 = int_to_ptr.vmem [resolvable:$true] %s32_s9 }
  0x10   :  { %s518_s10 = scalar_lea.vmem %s33_s9, 256  ;;  %p523_p6 = scmp.lt.s32.totalorder %s33_s9, %s33_s9 }
  0x11   :  { %p519_p5 = scmp.ne.s32.totalorder %s33_s9, %s518_s10  ;;  %p524_p7 = scmp.lt.s32.totalorder %s518_s10, %s518_s10 }
  0x13   :  { %p525_p8 = por %p524_p7, %p523_p6 }
  0x15   :  { %p526_p9 = pnand %p525_p8, %p519_p5 }
  0x17   :  { %529 = shalt.err (!%p526_p9)
}
  0x18   :  { %s560_s11 = smov 64   ;;  %s561_s12 = smov 4  }
  0x19   :  { %38 = dma.hbm_to_vmem [thread:$0]  %s702_s1, 256, %s33_s9, [#allocation6], %s560_s11, %s560_s11, %s561_s12  }
  0x1a   :  { %550 = dma.done.wait [#allocation3], 256  }
  0x1b   :  { %551 = vsyncadd [#allocation3], 4294967040 }
  0x1c   :  { %552 = dma.done.wait [#allocation6], 256  }
  0x1d   :  { %553 = vsyncadd [#allocation6], 4294967040  ;;  %v562_v0 = vmov 0.0   ;;  %vm563_vm0 = vmmov 0   ;;  %v472_v1 = vld [vmem:[#allocation5 + $0x8] sm:$0xff]   ;;  %v473_v2 = vld [vmem:[#allocation5] sm:$0xff]   ;;  %v65_v19 = vlaneseq }
  0x1e   :  { %415 = vmatprep.subr.bf16.mxu0 %v562_v0  ;;  %419 = vmatprep.mubr.msk.bf16.mxu0 %vm563_vm0, %v562_v0  ;;  %v56_v3 = vld [vmem:[#allocation2] sm:$0xff]  ;;  %v57_v4 = vld [vmem:[#allocation2 + $0x8] sm:$0xff]  ;;  %v474_v5 = vld [vmem:[%s704_s3 + $0x38] sm:$0xff]   ;;  %vm81_vm1 = vcmask 261120   ;;  %vm354_vm2 = vcmask 130048  }
  0x1f   :  { %423 = vmatprep.subr.bf16.mxu1 %v562_v0  ;;  %439 = vmatprep.mubr.msk.bf16.mxu1 %vm563_vm0, %v562_v0  ;;  %v58_v6 = vpack.c.bf16 %v57_v4, %v56_v3  ;;  %v475_v7 = vld [vmem:[%s704_s3 + $0x30] sm:$0xff]   ;;  %v476_v8 = vld [vmem:[%s704_s3 + $0x28] sm:$0xff]   ;;  %v477_v9 = vld [vmem:[%s704_s3 + $0x20] sm:$0xff]   ;;  %v66_v20 = vshrl.u32 %v65_v19, 7 }
  0x20   :  { %416 = vmatpush3.bf16.msra.mxu0 %v472_v1  ;;  %424 = vmatpush3.bf16.msra.mxu1 %v474_v5  ;;  %v478_v10 = vld [vmem:[%s704_s3 + $0x18] sm:$0xff]   ;;  %v479_v11 = vld [vmem:[%s704_s3 + $0x10] sm:$0xff]   ;;  %v480_v12 = vld [vmem:[%s704_s3 + $0x8] sm:$0xff]  }
  0x21   :  { %417 = vmatprep.subr.bf16.mxu0 %v562_v0  ;;  %425 = vmatprep.subr.bf16.mxu1 %v562_v0  ;;  %v481_v13 = vld [vmem:[%s704_s3] sm:$0xff]   ;;  %v482_v14 = vld [vmem:[%s706_s5 + $0x38] sm:$0xff]   ;;  %v483_v15 = vld [vmem:[%s706_s5 + $0x30] sm:$0xff]   ;;  %v67_v23 = vsub.s32 0, %v66_v20 }
  0x22   :  { %v484_v16 = vld [vmem:[%s706_s5 + $0x28] sm:$0xff]   ;;  %v485_v17 = vld [vmem:[%s706_s5 + $0x20] sm:$0xff]   ;;  %v486_v18 = vld [vmem:[%s706_s5 + $0x18] sm:$0xff]  }
  0x23   :  { %v63_v21 = vld [vmem:[%s703_s2] sm:$0x1]  ;;  %v487_v34 = vld [vmem:[%s706_s5 + $0x10] sm:$0xff]   ;;  %v488_v35 = vld [vmem:[%s706_s5 + $0x8] sm:$0xff]  }
  0x24   :  { %418 = vmatpush3.bf16.msra.mxu0 %v473_v2  ;;  %426 = vmatpush3.bf16.msra.mxu1 %v475_v7  ;;  %v64_v22 = vunpack.c.l.bf16 %v63_v21  ;;  %v489_v36 = vld [vmem:[%s706_s5] sm:$0xff]  }
  0x25   :  { %443 = vmatprep.subr.bf16.mxu0 %v562_v0  ;;  %427 = vmatprep.subr.bf16.mxu1 %v562_v0  ;;  %v145_v37 = vld [vmem:[%s705_s4] sm:$0x1]  ;;  %s564_s4 = smov [#allocation7]  }
  0x26   :  { %v68_v24 = vrot.slane %v64_v22, %v67_v23  ;;  %v146_v38 = vunpack.c.l.bf16 %v145_v37  ;;  %v259_v49 = vld [vmem:[%s707_s6] sm:$0x1]  ;;  %s362_s5 = sshll.u32 %s564_s4, 4  ;;  %s363_s5 = int_to_ptr.vmem [resolvable:$true] %s362_s5 }
  0x27   :  { %420 = vmatmul.mubr.msk.bf16.vlgmr.msra.gmra.mxu0 %vm81_vm1, %v58_v6  ;;  %v260_v50 = vunpack.c.l.bf16 %v259_v49  ;;  %s530_s26 = scalar_lea.vmem %s363_s5, 256  ;;  %p535_p11 = scmp.lt.s32.totalorder %s363_s5, %s363_s5 }
  0x28   :  { %459 = vmatprep.mubr.msk.bf16.mxu0 %vm563_vm0, %v562_v0  ;;  %428 = vmatpush3.bf16.msra.mxu1 %v476_v8  ;;  %v150_v39 = vrot.slane %v146_v38, %v67_v23  ;;  %p531_p10 = scmp.ne.s32.totalorder %s363_s5, %s530_s26  ;;  %p536_p12 = scmp.lt.s32.totalorder %s530_s26, %s530_s26 }
  0x29   :  { %429 = vmatprep.subr.bf16.mxu1 %v562_v0  ;;  %444 = vmatpush3.bf16.msra.mxu0 %v482_v14  ;;  %v264_v51 = vrot.slane %v260_v50, %v67_v23 }
  0x2a   :  { %445 = vmatprep.subr.bf16.mxu0 %v562_v0  ;;  %p537_p13 = por %p536_p12, %p535_p11 }
  0x2c   :  { %430 = vmatpush3.bf16.msra.mxu1 %v477_v9  ;;  %p538_p0 = pnand %p537_p13, %p531_p10 }
  0x2d   :  { %431 = vmatprep.subr.bf16.mxu1 %v562_v0  ;;  %446 = vmatpush3.bf16.msra.mxu0 %v483_v15 }
  0x2e   :  { %447 = vmatprep.subr.bf16.mxu0 %v562_v0 }
  0x30   :  { %432 = vmatpush3.bf16.msra.mxu1 %v478_v10 }
  0x31   :  { %433 = vmatprep.subr.bf16.mxu1 %v562_v0  ;;  %448 = vmatpush3.bf16.msra.mxu0 %v484_v16 }
  0x32   :  { %449 = vmatprep.subr.bf16.mxu0 %v562_v0 }
  0x34   :  { %434 = vmatpush3.bf16.msra.mxu1 %v479_v11 }
  0x35   :  { %435 = vmatprep.subr.bf16.mxu1 %v562_v0  ;;  %450 = vmatpush3.bf16.msra.mxu0 %v485_v17 }
  0x36   :  { %451 = vmatprep.subr.bf16.mxu0 %v562_v0 }
  0x38   :  { %436 = vmatpush3.bf16.msra.mxu1 %v480_v12 }
  0x39   :  { %437 = vmatprep.subr.bf16.mxu1 %v562_v0  ;;  %452 = vmatpush3.bf16.msra.mxu0 %v486_v18 }
  0x3a   :  { %453 = vmatprep.subr.bf16.mxu0 %v562_v0 }
  0x3c   :  { %438 = vmatpush3.bf16.msra.mxu1 %v481_v13 }
  0x3d   :  { %454 = vmatpush3.bf16.msra.mxu0 %v487_v34 }
  0x3e   :  { %455 = vmatprep.subr.bf16.mxu0 %v562_v0 }
  0x41   :  { %456 = vmatpush3.bf16.msra.mxu0 %v488_v35 }
  0x42   :  { %457 = vmatprep.subr.bf16.mxu0 %v562_v0 }
  0x45   :  { %458 = vmatpush3.bf16.msra.mxu0 %v489_v36 }
  0xe7   :  { %v119_v25 = vpop.f32.mrf.mxu0 }
  0xe8   :  { %v120_v27 = vadd.f32 %v119_v25, %v68_v24 }
  0xe9   :  { %v421_v26 = vpop.f32.mrf.mxu0 }
  0xea   :  { %v126_v31 = vmax.f32 %v120_v27, 0.0 }
  0xeb   :  { %v122_v28 = vpop.f32.mrf.mxu0 }
  0xec   :  { %v123_v29 = vadd.f32 %v122_v28, %v68_v24 }
  0xed   :  { %v422_v30 = vpop.f32.mrf.mxu0 }
  0xee   :  { %v127_v32 = vmax.f32 %v123_v29, 0.0 }
  0xf0   :  { %v128_v33 = vpack.c.bf16 %v127_v32, %v126_v31 }
  0xf2   :  { %440 = vmatmul.mubr.bf16.vlgmr.msra.gmra.mxu1 %v128_v33 }
 0x1b2   :  { %v233_v40 = vpop.f32.mrf.mxu1 }
 0x1b3   :  { %v234_v42 = vadd.f32 %v233_v40, %v150_v39 }
 0x1b4   :  { %v441_v41 = vpop.f32.mrf.mxu1 }
 0x1b5   :  { %v240_v46 = vmax.f32 %v234_v42, 0.0 }
 0x1b6   :  { %v236_v43 = vpop.f32.mrf.mxu1 }
 0x1b7   :  { %v237_v44 = vadd.f32 %v236_v43, %v150_v39 }
 0x1b8   :  { %v442_v45 = vpop.f32.mrf.mxu1 }
 0x1b9   :  { %v241_v47 = vmax.f32 %v237_v44, 0.0 }
 0x1bb   :  { %v242_v48 = vpack.c.bf16 %v241_v47, %v240_v46 }
 0x1bd   :  { %460 = vmatmul.mubr.bf16.vlgmr.msra.gmra.mxu0 %v242_v48 }
 0x27d   :  { %v347_v52 = vpop.f32.mrf.mxu0 }
 0x27e   :  { %v348_v53 = vadd.f32 %v347_v52, %v264_v51 }
 0x27f   :  { %v461_v54 = vpop.f32.mrf.mxu0 }
 0x280   :  { %355 = vst.msk [vmem:[#allocation7] sm:$0xff] %vm354_vm2, %v348_v53 }
 0x281   :  { %v350_v55 = vpop.f32.mrf.mxu0 }
 0x282   :  { %v351_v56 = vadd.f32 %v350_v55, %v264_v51 }
 0x283   :  { %v462_v57 = vpop.f32.mrf.mxu0 }
 0x284   :  { %356 = vst.msk [vmem:[#allocation7 + $0x8] sm:$0xff] %vm354_vm2, %v351_v56 }
 0x285   :  { %541 = shalt.err (!%p538_p0)
}
 0x286   :  { %368 = dma.vmem_to_hbm [thread:$0]  %s363_s5, 256, %s708_s7, [#allocation4], %s557_s27, %s557_s27, %s558_s28  }
 0x287   :  { %554 = dma.done.wait [#allocation4], 256  }
 0x288   :  { %555 = vsyncadd [#allocation4], 4294967040 }
 0x289   :  { %372 = vsyncpa [#allocation3], 1 }
 0x28a   :  { %373 = vsyncpa [#allocation6], 1 }
 0x28b   :  { %374 = vsyncpa [#allocation4], 1 }

</bundles_post_ra>
